<compile_context>
chip_gen: v5e
topology: v5e:2x2
jax: 0.10.0
libtpu: 0.0.40
codegen_flags: <defaults>
</compile_context>

<pallas_src>
import functools

import jax
import jax.numpy as jnp
from jax.experimental import pallas as pl
from jax.experimental.pallas import tpu as pltpu


def actor_critic_kernel(
    x_ref, w1_ref, b1_ref, w2_ref, b2_ref, w3_ref, b3_ref, out_ref,
    *, action_dim, hidden_dim, split_mxu,
):
    cdt = w1_ref.dtype
    # x arrives f32; cast to the compute dtype after the pipelined VMEM load
    # (free VPU work) instead of a separate XLA cast pass in the wrapper.
    x = x_ref[...].astype(cdt)  # [TB, S]

    # Fused layer 1: [actor_h1 | critic_h1]
    h = jnp.dot(x, w1_ref[...], preferred_element_type=jnp.float32) + b1_ref[...]
    h = jnp.maximum(h, 0.0).astype(cdt)

    H = hidden_dim
    if split_mxu:
        # v5e path: the MXU is 4x128x128, so the fused 256x256 block-diagonal
        # layer-2 weight decomposes into four 128^2 tiles of which two are
        # all-zero.  Run the two heads as separate 128-wide matmuls through
        # layers 2 and 3 instead (exactly the same math, half the pushes).
        ha = (jnp.dot(h[:, :H], w2_ref[:H, :H], preferred_element_type=jnp.float32)
              + b2_ref[:, :H])
        hc = (jnp.dot(h[:, H:], w2_ref[H:, H:], preferred_element_type=jnp.float32)
              + b2_ref[:, H:])
        ha = jnp.maximum(ha, 0.0).astype(cdt)
        hc = jnp.maximum(hc, 0.0).astype(cdt)
        y = (jnp.dot(ha, w3_ref[:H, :], preferred_element_type=jnp.float32)
             + jnp.dot(hc, w3_ref[H:, :], preferred_element_type=jnp.float32)
             + b3_ref[...])
    else:
        # v6e/v7x path: 256x256 MXU takes the whole fused weight in one tile.
        h = jnp.dot(h, w2_ref[...], preferred_element_type=jnp.float32) + b2_ref[...]
        h = jnp.maximum(h, 0.0).astype(cdt)
        y = jnp.dot(h, w3_ref[...], preferred_element_type=jnp.float32) + b3_ref[...]

    # Numerically stable softmax over the actor-logit lanes only.
    lane = jax.lax.broadcasted_iota(jnp.int32, y.shape, dimension=1)
    logits = jnp.where(lane < action_dim, y, -jnp.inf)
    m = jnp.max(logits, axis=-1, keepdims=True)
    e = jnp.exp(logits - m)                      # exp(-inf) = 0 on masked lanes
    denom = jnp.sum(e, axis=-1, keepdims=True)
    # Exact reciprocal: probs feed Categorical sampling / log-probs downstream.
    probs = e * pl.reciprocal(denom, approx=False)

    # Lane-dense slab: probs in cols [0, A), raw value in col A, zeros
    # elsewhere (e == 0 there).  Single unmasked [TB, P] store; out dtype is
    # the compute dtype (bf16 on the fast path) to halve write-back bytes.
    out_ref[...] = jnp.where(lane == action_dim, y, probs).astype(out_ref.dtype)


def fuse_params(p, action_dim, compute_dtype=jnp.bfloat16):
    """Pack per-layer actor/critic weights into 3 fused matrices."""
    S, H = p["aw1"].shape
    P = ((action_dim + 1 + 127) // 128) * 128  # lane-dense output width

    w1 = jnp.concatenate([p["aw1"], p["cw1"]], axis=1)            # (S, 2H)
    b1 = jnp.concatenate([p["ab1"], p["cb1"]], axis=1)            # (1, 2H)

    w2 = jnp.zeros((2 * H, 2 * H), jnp.float32)                   # block diag
    w2 = w2.at[:H, :H].set(p["aw2"]).at[H:, H:].set(p["cw2"])
    b2 = jnp.concatenate([p["ab2"], p["cb2"]], axis=1)            # (1, 2H)

    w3 = jnp.zeros((2 * H, P), jnp.float32)
    w3 = w3.at[:H, :action_dim].set(p["aw3"])
    w3 = w3.at[H:, action_dim:action_dim + 1].set(p["cw3"])
    b3 = jnp.zeros((1, P), jnp.float32)
    b3 = b3.at[:, :action_dim].set(p["ab3"])
    b3 = b3.at[:, action_dim:action_dim + 1].set(p["cb3"])

    return {
        "w1": w1.astype(compute_dtype), "b1": b1.astype(jnp.float32),
        "w2": w2.astype(compute_dtype), "b2": b2.astype(jnp.float32),
        "w3": w3.astype(compute_dtype), "b3": b3.astype(jnp.float32),
    }


def _device_kind():
    try:
        return jax.devices()[0].device_kind.lower()
    except Exception:
        return ""


def _pick_batch_tile(B, batch_tile):
    """Full batch if it fits; else the largest multiple-of-8 divisor of B
    (avoids a padded tail tile full of garbage rows); else fall back to
    batch_tile with a padded last tile."""
    if B <= batch_tile:
        return B
    for t in range(batch_tile, 7, -8):
        if B % t == 0:
            return t
    return batch_tile


def actor_critic_forward(x, fused, action_dim, *, batch_tile=1024,
                         force_split_mxu=None):
    """x: [B, state_dim] f32.  Returns (probs [B, action_dim] f32, value [B] f32)."""
    B, S = x.shape
    w1, b1 = fused["w1"], fused["b1"]
    w2, b2 = fused["w2"], fused["b2"]
    w3, b3 = fused["w3"], fused["b3"]
    H2 = w1.shape[1]
    H = H2 // 2
    P = w3.shape[1]
    out_dtype = w1.dtype  # bf16 slab on the fast path, f32 on the exact path

    kind = _device_kind()
    if force_split_mxu is None:
        split_mxu = (("v5 lite" in kind) or ("v5e" in kind) or ("v5litepod" in kind))
    else:
        split_mxu = bool(force_split_mxu)
    split_mxu = split_mxu and (H % 128 == 0)

    tb = _pick_batch_tile(B, batch_tile)
    n_steps = pl.cdiv(B, tb)
    grid = (n_steps,)

    # v7x has 2 TensorCores per chip; core-parallel semantics actually shard
    # grid steps across them.  Plain "parallel" elsewhere (single TC).
    if ("v7" in kind) and (n_steps >= 2):
        dim_sem = (pltpu.CORE_PARALLEL,)
    else:
        dim_sem = ("parallel",)

    kernel = functools.partial(
        actor_critic_kernel, action_dim=action_dim, hidden_dim=H,
        split_mxu=split_mxu)

    out = pl.pallas_call(
        kernel,
        grid=grid,
        in_specs=[
            pl.BlockSpec((tb, S), lambda i: (i, 0)),    # x: batch-tiled, stays f32
            pl.BlockSpec((S, H2), lambda i: (0, 0)),    # weights: VMEM-resident
            pl.BlockSpec((1, H2), lambda i: (0, 0)),
            pl.BlockSpec((H2, H2), lambda i: (0, 0)),
            pl.BlockSpec((1, H2), lambda i: (0, 0)),
            pl.BlockSpec((H2, P), lambda i: (0, 0)),
            pl.BlockSpec((1, P), lambda i: (0, 0)),
        ],
        out_specs=pl.BlockSpec((tb, P), lambda i: (i, 0)),
        out_shape=jax.ShapeDtypeStruct((B, P), out_dtype),
        compiler_params=pltpu.CompilerParams(dimension_semantics=dim_sem),
    )(x, w1, b1, w2, b2, w3, b3)

    probs = out[:, :action_dim].astype(jnp.float32)
    value = out[:, action_dim].astype(jnp.float32)
    return probs, value


def init_params(key, state_dim, action_dim, hidden_dim):
    """Deterministic synthetic parameters (nn.Linear layouts stored as
    [in_features, out_features])."""
    keys = jax.random.split(key, 12)
    scale = 0.1

    def w(k, shape):
        return (scale * jax.random.normal(k, shape)).astype(jnp.float32)

    return {
        # actor: state_dim -> hidden -> hidden -> action_dim
        "aw1": w(keys[0], (state_dim, hidden_dim)),
        "ab1": w(keys[1], (1, hidden_dim)),
        "aw2": w(keys[2], (hidden_dim, hidden_dim)),
        "ab2": w(keys[3], (1, hidden_dim)),
        "aw3": w(keys[4], (hidden_dim, action_dim)),
        "ab3": w(keys[5], (1, action_dim)),
        # critic: state_dim -> hidden -> hidden -> 1
        "cw1": w(keys[6], (state_dim, hidden_dim)),
        "cb1": w(keys[7], (1, hidden_dim)),
        "cw2": w(keys[8], (hidden_dim, hidden_dim)),
        "cb2": w(keys[9], (1, hidden_dim)),
        "cw3": w(keys[10], (hidden_dim, 1)),
        "cb3": w(keys[11], (1, 1)),
    }


def reference_forward(x, p):
    """Pure-JAX reference matching the PyTorch module semantics."""
    h = jnp.maximum(x @ p["aw1"] + p["ab1"], 0.0)
    h = jnp.maximum(h @ p["aw2"] + p["ab2"], 0.0)
    probs = jax.nn.softmax(h @ p["aw3"] + p["ab3"], axis=-1)
    c = jnp.maximum(x @ p["cw1"] + p["cb1"], 0.0)
    c = jnp.maximum(c @ p["cw2"] + p["cb2"], 0.0)
    value = (c @ p["cw3"] + p["cb3"]).squeeze(-1)
    return probs, value


if __name__ == "__main__":
    batch = 8
    state_dim = 16
    action_dim = 8
    hidden_dim = 128  # module default

    key = jax.random.PRNGKey(0)
    k_x, k_p, k_b1, k_b2 = jax.random.split(key, 4)
    x = jax.random.normal(k_x, (batch, state_dim), dtype=jnp.float32)
    params = init_params(k_p, state_dim, action_dim, hidden_dim)

    ref_probs, ref_value = reference_forward(x, params)

    # --- f32 compute path: validates head-fusion / output packing exactly ---
    fused_f32 = fuse_params(params, action_dim, compute_dtype=jnp.float32)
    probs32, value32 = actor_critic_forward(x, fused_f32, action_dim)
    jax.block_until_ready((probs32, value32))
    assert probs32.shape == (batch, action_dim)
    assert value32.shape == (batch,)
    assert jnp.allclose(probs32, ref_probs, atol=5e-3, rtol=5e-3)
    assert jnp.allclose(value32, ref_value, atol=5e-3, rtol=5e-3)
    assert jnp.allclose(jnp.sum(probs32, axis=-1), 1.0, atol=2e-3)

    # --- bf16 compute + bf16 output slab (default fast path) ---
    fused = fuse_params(params, action_dim)  # bf16 weights
    probs, value = actor_critic_forward(x, fused, action_dim)
    jax.block_until_ready((probs, value))
    assert probs.shape == (batch, action_dim)
    assert value.shape == (batch,)
    assert jnp.allclose(probs, ref_probs, atol=2e-2, rtol=2e-2)
    assert jnp.allclose(value, ref_value, atol=2e-2, rtol=2e-2)
    assert jnp.allclose(jnp.sum(probs, axis=-1), 1.0, atol=1e-2)

    # --- v5e-style split-MXU path, forced so it is covered on every gen ---
    probs_s, value_s = actor_critic_forward(x, fused, action_dim,
                                            force_split_mxu=True)
    jax.block_until_ready((probs_s, value_s))
    assert jnp.allclose(probs_s, ref_probs, atol=2e-2, rtol=2e-2)
    assert jnp.allclose(value_s, ref_value, atol=2e-2, rtol=2e-2)

    # --- larger batches: divisor-tiled grid (1320 -> tb=440, 3 steps) and a
    #     batch with no multiple-of-8 divisor (1100 -> padded last tile) ---
    for big, kb in ((1320, k_b1), (1100, k_b2)):
        x_big = jax.random.normal(kb, (big, state_dim), dtype=jnp.float32)
        ref_probs_b, ref_value_b = reference_forward(x_big, params)
        probs_b, value_b = actor_critic_forward(x_big, fused, action_dim)
        jax.block_until_ready((probs_b, value_b))
        assert probs_b.shape == (big, action_dim)
        assert value_b.shape == (big,)
        assert jnp.allclose(probs_b, ref_probs_b, atol=2e-2, rtol=2e-2)
        assert jnp.allclose(value_b, ref_value_b, atol=2e-2, rtol=2e-2)

    print("KERNEL_OK")
</pallas_src>

<mosaic_0001>
module attributes {stable_mosaic.version = 11 : i64} {
  func.func @actor_critic_kernel(%arg0: i32, %arg1: memref<8x16xf32, #tpu.memory_space<vmem>>, %arg2: memref<16x256xf32, #tpu.memory_space<vmem>>, %arg3: memref<1x256xf32, #tpu.memory_space<vmem>>, %arg4: memref<256x256xf32, #tpu.memory_space<vmem>>, %arg5: memref<1x256xf32, #tpu.memory_space<vmem>>, %arg6: memref<256x128xf32, #tpu.memory_space<vmem>>, %arg7: memref<1x128xf32, #tpu.memory_space<vmem>>, %arg8: memref<8x128xf32, #tpu.memory_space<vmem>>) attributes {dimension_semantics = [#tpu.dimension_semantics<parallel>], iteration_bounds = array<i64: 1>, scalar_prefetch = 0 : i64, scratch_operands = 0 : i64, tpu.core_type = #tpu.core_type<tc>, window_params = [{transform_indices = @transform_0, window_bounds = array<i64: 8, 16>}, {pipeline_mode = #tpu.pipeline_mode<synchronous>, transform_indices = @transform_1, window_bounds = array<i64: 16, 256>}, {pipeline_mode = #tpu.pipeline_mode<synchronous>, transform_indices = @transform_2, window_bounds = array<i64: 1, 256>}, {pipeline_mode = #tpu.pipeline_mode<synchronous>, transform_indices = @transform_3, window_bounds = array<i64: 256, 256>}, {pipeline_mode = #tpu.pipeline_mode<synchronous>, transform_indices = @transform_4, window_bounds = array<i64: 1, 256>}, {pipeline_mode = #tpu.pipeline_mode<synchronous>, transform_indices = @transform_5, window_bounds = array<i64: 256, 128>}, {pipeline_mode = #tpu.pipeline_mode<synchronous>, transform_indices = @transform_6, window_bounds = array<i64: 1, 128>}, {transform_indices = @transform_7, window_bounds = array<i64: 8, 128>}]} {
    %c0 = arith.constant 0 : index
    %c0_0 = arith.constant 0 : index
    %0 = vector.load %arg1[%c0, %c0_0] : memref<8x16xf32, #tpu.memory_space<vmem>>, vector<8x16xf32>
    %c0_1 = arith.constant 0 : index
    %c0_2 = arith.constant 0 : index
    %1 = vector.load %arg2[%c0_1, %c0_2] : memref<16x256xf32, #tpu.memory_space<vmem>>, vector<16x256xf32>
    %cst = arith.constant dense<0.000000e+00> : vector<8x256xf32>
    %2 = tpu.matmul %0, %1, %cst {dimension_numbers = #tpu.dot_dimension_numbers<[1], [0], [0], [1], [0, 0, 1, 1], [], []>} : vector<8x16xf32>, vector<16x256xf32>, vector<8x256xf32> -> vector<8x256xf32>
    %c0_3 = arith.constant 0 : index
    %c0_4 = arith.constant 0 : index
    %3 = vector.load %arg3[%c0_3, %c0_4] : memref<1x256xf32, #tpu.memory_space<vmem>>, vector<1x256xf32>
    %4 = vector.broadcast %3 : vector<1x256xf32> to vector<8x256xf32>
    %5 = arith.addf %2, %4 : vector<8x256xf32>
    %cst_5 = arith.constant 0.000000e+00 : f32
    %6 = vector.broadcast %cst_5 : f32 to vector<8x256xf32>
    %7 = arith.maximumf %5, %6 : vector<8x256xf32>
    %c0_6 = arith.constant 0 : index
    %c0_7 = arith.constant 0 : index
    %8 = vector.load %arg4[%c0_6, %c0_7] : memref<256x256xf32, #tpu.memory_space<vmem>>, vector<256x256xf32>
    %cst_8 = arith.constant dense<0.000000e+00> : vector<8x256xf32>
    %9 = tpu.matmul %7, %8, %cst_8 {dimension_numbers = #tpu.dot_dimension_numbers<[1], [0], [0], [1], [0, 0, 1, 1], [], []>} : vector<8x256xf32>, vector<256x256xf32>, vector<8x256xf32> -> vector<8x256xf32>
    %c0_9 = arith.constant 0 : index
    %c0_10 = arith.constant 0 : index
    %10 = vector.load %arg5[%c0_9, %c0_10] : memref<1x256xf32, #tpu.memory_space<vmem>>, vector<1x256xf32>
    %11 = vector.broadcast %10 : vector<1x256xf32> to vector<8x256xf32>
    %12 = arith.addf %9, %11 : vector<8x256xf32>
    %cst_11 = arith.constant 0.000000e+00 : f32
    %13 = vector.broadcast %cst_11 : f32 to vector<8x256xf32>
    %14 = arith.maximumf %12, %13 : vector<8x256xf32>
    %c0_12 = arith.constant 0 : index
    %c0_13 = arith.constant 0 : index
    %15 = vector.load %arg6[%c0_12, %c0_13] : memref<256x128xf32, #tpu.memory_space<vmem>>, vector<256x128xf32>
    %cst_14 = arith.constant dense<0.000000e+00> : vector<8x128xf32>
    %16 = tpu.matmul %14, %15, %cst_14 {dimension_numbers = #tpu.dot_dimension_numbers<[1], [0], [0], [1], [0, 0, 1, 1], [], []>} : vector<8x256xf32>, vector<256x128xf32>, vector<8x128xf32> -> vector<8x128xf32>
    %c0_15 = arith.constant 0 : index
    %c0_16 = arith.constant 0 : index
    %17 = vector.load %arg7[%c0_15, %c0_16] : memref<1x128xf32, #tpu.memory_space<vmem>>, vector<1x128xf32>
    %18 = vector.broadcast %17 : vector<1x128xf32> to vector<8x128xf32>
    %19 = arith.addf %16, %18 : vector<8x128xf32>
    %20 = tpu.iota {dimensions = array<i32: 1>} : vector<8x128xi32>
    %c8_i32 = arith.constant 8 : i32
    %21 = vector.broadcast %c8_i32 : i32 to vector<8x128xi32>
    %22 = arith.cmpi slt, %20, %21 : vector<8x128xi32>
    %cst_17 = arith.constant 0xFF800000 : f32
    %23 = vector.broadcast %cst_17 : f32 to vector<8x128xf32>
    %24 = arith.select %22, %19, %23 : vector<8x128xi1>, vector<8x128xf32>
    %cst_18 = arith.constant dense<0xFF800000> : vector<8xf32>
    %25 = vector.multi_reduction <maximumf>, %24, %cst_18 [1] : vector<8x128xf32> to vector<8xf32>
    %26 = vector.shape_cast %25 : vector<8xf32> to vector<8x1xf32>
    %27 = vector.broadcast %26 : vector<8x1xf32> to vector<8x128xf32>
    %28 = arith.subf %24, %27 : vector<8x128xf32>
    %29 = math.exp %28 : vector<8x128xf32>
    %cst_19 = arith.constant dense<0.000000e+00> : vector<8xf32>
    %30 = vector.multi_reduction <add>, %29, %cst_19 [1] : vector<8x128xf32> to vector<8xf32>
    %31 = vector.shape_cast %30 : vector<8xf32> to vector<8x1xf32>
    %32 = tpu.reciprocal %31 : vector<8x1xf32> -> vector<8x1xf32>
    %33 = vector.broadcast %32 : vector<8x1xf32> to vector<8x128xf32>
    %34 = arith.mulf %29, %33 : vector<8x128xf32>
    %c8_i32_20 = arith.constant 8 : i32
    %35 = vector.broadcast %c8_i32_20 : i32 to vector<8x128xi32>
    %36 = arith.cmpi eq, %20, %35 : vector<8x128xi32>
    %37 = arith.select %36, %19, %34 : vector<8x128xi1>, vector<8x128xf32>
    %c0_21 = arith.constant 0 : index
    %c0_22 = arith.constant 0 : index
    %38 = vector.load %arg8[%c0_21, %c0_22] : memref<8x128xf32, #tpu.memory_space<vmem>>, vector<8x128xf32>
    tpu.vector_store %arg8[%c0_21, %c0_22], %37 {strides = array<i32>} : memref<8x128xf32, #tpu.memory_space<vmem>>, vector<8x128xf32>,
    return
  }
  func.func @transform_0(%arg0: i32) -> (i32, i32) {
    %c0_i32 = arith.constant 0 : i32
    %c0_i32_0 = arith.constant 0 : i32
    return %arg0, %c0_i32 : i32, i32
  }
  func.func @transform_1(%arg0: i32) -> (i32, i32) {
    %c0_i32 = arith.constant 0 : i32
    %c0_i32_0 = arith.constant 0 : i32
    %c0_i32_1 = arith.constant 0 : i32
    return %c0_i32, %c0_i32_0 : i32, i32
  }
  func.func @transform_2(%arg0: i32) -> (i32, i32) {
    %c0_i32 = arith.constant 0 : i32
    %c0_i32_0 = arith.constant 0 : i32
    %c0_i32_1 = arith.constant 0 : i32
    return %c0_i32, %c0_i32_0 : i32, i32
  }
  func.func @transform_3(%arg0: i32) -> (i32, i32) {
    %c0_i32 = arith.constant 0 : i32
    %c0_i32_0 = arith.constant 0 : i32
    %c0_i32_1 = arith.constant 0 : i32
    return %c0_i32, %c0_i32_0 : i32, i32
  }
  func.func @transform_4(%arg0: i32) -> (i32, i32) {
    %c0_i32 = arith.constant 0 : i32
    %c0_i32_0 = arith.constant 0 : i32
    %c0_i32_1 = arith.constant 0 : i32
    return %c0_i32, %c0_i32_0 : i32, i32
  }
  func.func @transform_5(%arg0: i32) -> (i32, i32) {
    %c0_i32 = arith.constant 0 : i32
    %c0_i32_0 = arith.constant 0 : i32
    %c0_i32_1 = arith.constant 0 : i32
    return %c0_i32, %c0_i32_0 : i32, i32
  }
  func.func @transform_6(%arg0: i32) -> (i32, i32) {
    %c0_i32 = arith.constant 0 : i32
    %c0_i32_0 = arith.constant 0 : i32
    %c0_i32_1 = arith.constant 0 : i32
    return %c0_i32, %c0_i32_0 : i32, i32
  }
  func.func @transform_7(%arg0: i32) -> (i32, i32) {
    %c0_i32 = arith.constant 0 : i32
    %c0_i32_0 = arith.constant 0 : i32
    return %arg0, %c0_i32 : i32, i32
  }
}

</mosaic_0001>

<bundles_post_ra>
// kernel: tpu_custom_call.1
= control target key start
LH: loop header
LB: loop body
LE: loop exit
PB: predicated region body
PF: predicated region fallthrough
CT: control target
= control target key end

     0   :  { %12 = vsyncpa [#allocation3], 0  ;;  %s677_s0 = inlined_call_operand.hbm [shape: f32[8,16], index: 0, kind: input, shape index: {}]   ;;  %s678_s1 = inlined_call_operand.hbm [shape: f32[16,256], index: 1, kind: input, shape index: {}]   ;;  %s679_s2 = inlined_call_operand.hbm [shape: f32[1,256], index: 2, kind: input, shape index: {}]   ;;  %s680_s3 = inlined_call_operand.hbm [shape: f32[256,256], index: 3, kind: input, shape index: {}]   ;;  %s681_s4 = inlined_call_operand.vmem [shape: f32[1,256], index: 4, kind: input, shape index: {}]   ;;  %s682_s5 = inlined_call_operand.hbm [shape: f32[256,128], index: 5, kind: input, shape index: {}]   ;;  %s683_s6 = inlined_call_operand.vmem [shape: f32[1,128], index: 6, kind: input, shape index: {}]   ;;  %s684_s7 = inlined_call_operand.hbm [shape: f32[8,128], index: 7, kind: output, shape index: {}]  }
   0x1   :  { %13 = vsyncpa [#allocation6], 0 }
   0x2   :  { %14 = vsyncpa [#allocation9], 0  ;;  %s31_s26 = sshll.u32 %s678_s1, 4  ;;  %s32_s26 = int_to_ptr.hbm [resolvable:$true] %s31_s26 }
   0x3   :  { %15 = vsyncpa [#allocation4], 0  ;;  %s603_s27 = smov [#allocation5]   ;;  %s55_s8 = sshll.u32 %s680_s3, 4  ;;  %s56_s8 = int_to_ptr.hbm [resolvable:$true] %s55_s8 }
   0x4   :  { %s33_s28 = sshll.u32 %s603_s27, 4  ;;  %s604_s9 = smov 256   ;;  %s34_s28 = int_to_ptr.vmem [resolvable:$true] %s33_s28 }
   0x5   :  { %s605_s10 = smov 16   ;;  %s606_s11 = smov [#allocation8]  }
   0x6   :  { %39 = dma.hbm_to_vmem [thread:$0]  %s32_s26, 512, %s34_s28, [#allocation6], %s604_s9, %s604_s9, %s605_s10  }
   0x7   :  { %s57_s12 = sshll.u32 %s606_s11, 4  ;;  %s21_s15 = sshll.u32 %s677_s0, 4  ;;  %s58_s12 = int_to_ptr.vmem [resolvable:$true] %s57_s12  ;;  %s22_s15 = int_to_ptr.hbm [resolvable:$true] %s21_s15 }
   0x8   :  { %63 = dma.hbm_to_vmem [thread:$0]  %s56_s8, 8192, %s58_s12, [#allocation9], %s604_s9, %s604_s9, %s605_s10  }
   0x9   :  { %s45_s17 = sshll.u32 %s679_s2, 4  ;;  %s607_s18 = smov [#allocation2]   ;;  %s46_s17 = int_to_ptr.hbm [resolvable:$true] %s45_s17 }
   0xa   :  { %s23_s19 = sshll.u32 %s607_s18, 4  ;;  %s608_s3 = smov [#allocation7]   ;;  %s24_s19 = int_to_ptr.vmem [resolvable:$true] %s23_s19 }
   0xb   :  { %26 = dma.hbm_to_vmem [thread:$0]  %s22_s15, 128, %s24_s19, [#allocation3]  }
   0xc   :  { %s47_s20 = sshll.u32 %s608_s3, 4  ;;  %s70_s23 = sshll.u32 %s682_s5, 4  ;;  %s48_s20 = int_to_ptr.vmem [resolvable:$true] %s47_s20  ;;  %s71_s23 = int_to_ptr.hbm [resolvable:$true] %s70_s23 }
   0xd   :  { %50 = dma.hbm_to_vmem [thread:$0]  %s46_s17, 32, %s48_s20, [#allocation6]  }
   0xe   :  { %s609_s0 = smov [#allocation10]   ;;  %s610_s25 = smov 128  }
   0xf   :  { %s72_s24 = sshll.u32 %s609_s0, 4  ;;  %s611_s26 = smov 8   ;;  %s73_s24 = int_to_ptr.vmem [resolvable:$true] %s72_s24 }
  0x10   :  { %78 = dma.hbm_to_vmem [thread:$0]  %s71_s23, 4096, %s73_s24, [#allocation9], %s610_s25, %s610_s25, %s611_s26  }
  0x11   :  { %595 = dma.done.wait [#allocation3], 128  }
  0x12   :  { %596 = vsyncadd [#allocation3], 4294967168 }
  0x13   :  { %597 = dma.done.wait [#allocation6], 544  }
  0x14   :  { %598 = vsyncadd [#allocation6], 4294966752 }
  0x15   :  { %599 = dma.done.wait [#allocation9], 12288  }
  0x16   :  { %600 = vsyncadd [#allocation9], 4294955008  ;;  %v104_v0 = vld [vmem:[#allocation5 + $0x10] sm:$0xff]  ;;  %v102_v1 = vld [vmem:[#allocation5] sm:$0xff]  ;;  %vm112_vm0 = vcmask 130048   ;;  %s422_s8 = sshll.u32 %s684_s7, 4  ;;  %s423_s8 = int_to_ptr.hbm [resolvable:$true] %s422_s8 }
  0x17   :  { %v105_v2 = vld [vmem:[#allocation5 + $0x18] sm:$0xff]  ;;  %130 = vmatpush.msra.mxu0 %v104_v0  ;;  %v103_v4 = vld [vmem:[#allocation5 + $0x8] sm:$0xff] }
  0x18   :  { %150 = vmatpush.msra.mxu1 %v105_v2  ;;  %v101_v3 = vld [vmem:[#allocation2] sm:$0xff]  ;;  %v186_v7 = vld [vmem:[#allocation8 + $0xe0] sm:$0xff]  ;;  %v187_v10 = vld [vmem:[#allocation8 + $0xe8] sm:$0xff] }
  0x19   :  { %v188_v5 = vld [vmem:[#allocation8 + $0xf0] sm:$0xff]  ;;  %v189_v6 = vld [vmem:[#allocation8 + $0xf8] sm:$0xff]  ;;  %131 = vmatpush.msra.mxu0 %v102_v1  ;;  %v218_v12 = vld [vmem:[#allocation8 + $0x1e0] sm:$0xff] }
  0x1a   :  { %228 = vmatpush.msra.mxu2 %v188_v5  ;;  %151 = vmatpush.msra.mxu1 %v103_v4  ;;  %v220_v8 = vld [vmem:[#allocation8 + $0x1f0] sm:$0xff]  ;;  %v221_v9 = vld [vmem:[#allocation8 + $0x1f8] sm:$0xff]  ;;  %v219_v13 = vld [vmem:[#allocation8 + $0x1e8] sm:$0xff] }
  0x1b   :  { %434 = vmatmul.msk.f32.vlgmr.msra.gmra.mxu0 %vm112_vm0, %v101_v3  ;;  %435 = vmatmul.msk.f32.vlgmr.msra.gmra.mxu1 %vm112_vm0, %v101_v3  ;;  %v184_v11 = vld [vmem:[#allocation8 + $0xd0] sm:$0xff]  ;;  %v185_v14 = vld [vmem:[#allocation8 + $0xd8] sm:$0xff]  ;;  %v182_v15 = vld [vmem:[#allocation8 + $0xc0] sm:$0xff] }
  0x1c   :  { %268 = vmatpush.msrb.mxu0 %v189_v6  ;;  %229 = vmatpush.msra.mxu2 %v186_v7  ;;  %v216_v16 = vld [vmem:[#allocation8 + $0x1d0] sm:$0xff]  ;;  %v217_v17 = vld [vmem:[#allocation8 + $0x1d8] sm:$0xff]  ;;  %v183_v18 = vld [vmem:[#allocation8 + $0xc8] sm:$0xff] }
  0x1d   :  { %248 = vmatpush.msra.mxu3 %v220_v8  ;;  %288 = vmatpush.msrb.mxu1 %v221_v9  ;;  %v180_v19 = vld [vmem:[#allocation8 + $0xb0] sm:$0xff]  ;;  %v214_v20 = vld [vmem:[#allocation8 + $0x1c0] sm:$0xff]  ;;  %v215_v21 = vld [vmem:[#allocation8 + $0x1c8] sm:$0xff] }
  0x1e   :  { %269 = vmatpush.msrb.mxu0 %v187_v10  ;;  %230 = vmatpush.msra.mxu2 %v184_v11  ;;  %v181_v22 = vld [vmem:[#allocation8 + $0xb8] sm:$0xff]  ;;  %v178_v23 = vld [vmem:[#allocation8 + $0xa0] sm:$0xff]  ;;  %v212_v24 = vld [vmem:[#allocation8 + $0x1b0] sm:$0xff] }
  0x1f   :  { %249 = vmatpush.msra.mxu3 %v218_v12  ;;  %289 = vmatpush.msrb.mxu1 %v219_v13  ;;  %v213_v25 = vld [vmem:[#allocation8 + $0x1b8] sm:$0xff]  ;;  %v179_v26 = vld [vmem:[#allocation8 + $0xa8] sm:$0xff]  ;;  %v176_v27 = vld [vmem:[#allocation8 + $0x90] sm:$0xff] }
  0x20   :  { %270 = vmatpush.msrb.mxu0 %v185_v14  ;;  %231 = vmatpush.msra.mxu2 %v182_v15  ;;  %v210_v28 = vld [vmem:[#allocation8 + $0x1a0] sm:$0xff]  ;;  %v211_v29 = vld [vmem:[#allocation8 + $0x1a8] sm:$0xff]  ;;  %v177_v30 = vld [vmem:[#allocation8 + $0x98] sm:$0xff] }
  0x21   :  { %250 = vmatpush.msra.mxu3 %v216_v16  ;;  %290 = vmatpush.msrb.mxu1 %v217_v17  ;;  %v174_v31 = vld [vmem:[#allocation8 + $0x80] sm:$0xff]  ;;  %v208_v32 = vld [vmem:[#allocation8 + $0x190] sm:$0xff]  ;;  %v209_v33 = vld [vmem:[#allocation8 + $0x198] sm:$0xff] }
  0x22   :  { %271 = vmatpush.msrb.mxu0 %v183_v18  ;;  %232 = vmatpush.msra.mxu2 %v180_v19  ;;  %v175_v34 = vld [vmem:[#allocation8 + $0x88] sm:$0xff]  ;;  %v172_v35 = vld [vmem:[#allocation8 + $0x70] sm:$0xff]  ;;  %v206_v36 = vld [vmem:[#allocation8 + $0x180] sm:$0xff] }
  0x23   :  { %251 = vmatpush.msra.mxu3 %v214_v20  ;;  %291 = vmatpush.msrb.mxu1 %v215_v21  ;;  %v207_v37 = vld [vmem:[#allocation8 + $0x188] sm:$0xff]  ;;  %v173_v38 = vld [vmem:[#allocation8 + $0x78] sm:$0xff]  ;;  %v170_v39 = vld [vmem:[#allocation8 + $0x60] sm:$0xff] }
  0x24   :  { %272 = vmatpush.msrb.mxu0 %v181_v22  ;;  %233 = vmatpush.msra.mxu2 %v178_v23  ;;  %v204_v40 = vld [vmem:[#allocation8 + $0x170] sm:$0xff]  ;;  %v205_v41 = vld [vmem:[#allocation8 + $0x178] sm:$0xff]  ;;  %v171_v42 = vld [vmem:[#allocation8 + $0x68] sm:$0xff] }
  0x25   :  { %252 = vmatpush.msra.mxu3 %v212_v24  ;;  %292 = vmatpush.msrb.mxu1 %v213_v25  ;;  %v168_v43 = vld [vmem:[#allocation8 + $0x50] sm:$0xff]  ;;  %v202_v44 = vld [vmem:[#allocation8 + $0x160] sm:$0xff]  ;;  %v203_v45 = vld [vmem:[#allocation8 + $0x168] sm:$0xff] }
  0x26   :  { %273 = vmatpush.msrb.mxu0 %v179_v26  ;;  %234 = vmatpush.msra.mxu2 %v176_v27  ;;  %v169_v46 = vld [vmem:[#allocation8 + $0x58] sm:$0xff]  ;;  %v166_v47 = vld [vmem:[#allocation8 + $0x40] sm:$0xff]  ;;  %v200_v48 = vld [vmem:[#allocation8 + $0x150] sm:$0xff] }
  0x27   :  { %253 = vmatpush.msra.mxu3 %v210_v28  ;;  %293 = vmatpush.msrb.mxu1 %v211_v29  ;;  %v201_v49 = vld [vmem:[#allocation8 + $0x158] sm:$0xff]  ;;  %v167_v50 = vld [vmem:[#allocation8 + $0x48] sm:$0xff]  ;;  %v164_v51 = vld [vmem:[#allocation8 + $0x30] sm:$0xff] }
  0x28   :  { %274 = vmatpush.msrb.mxu0 %v177_v30  ;;  %235 = vmatpush.msra.mxu2 %v174_v31  ;;  %v198_v52 = vld [vmem:[#allocation8 + $0x140] sm:$0xff]  ;;  %v199_v53 = vld [vmem:[#allocation8 + $0x148] sm:$0xff]  ;;  %v165_v54 = vld [vmem:[#allocation8 + $0x38] sm:$0xff] }
  0x29   :  { %254 = vmatpush.msra.mxu3 %v208_v32  ;;  %294 = vmatpush.msrb.mxu1 %v209_v33  ;;  %v162_v55 = vld [vmem:[#allocation8 + $0x20] sm:$0xff]  ;;  %v196_v56 = vld [vmem:[#allocation8 + $0x130] sm:$0xff]  ;;  %v163_v57 = vld [vmem:[#allocation8 + $0x28] sm:$0xff] }
  0x2a   :  { %275 = vmatpush.msrb.mxu0 %v175_v34  ;;  %236 = vmatpush.msra.mxu2 %v172_v35  ;;  %v197_v58 = vld [vmem:[#allocation8 + $0x138] sm:$0xff]  ;;  %v160_v59 = vld [vmem:[#allocation8 + $0x10] sm:$0xff]  ;;  %v194_v60 = vld [vmem:[#allocation8 + $0x120] sm:$0xff] }
  0x2b   :  { %255 = vmatpush.msra.mxu3 %v206_v36  ;;  %295 = vmatpush.msrb.mxu1 %v207_v37  ;;  %v161_v61 = vld [vmem:[#allocation8 + $0x18] sm:$0xff]  ;;  %v195_v62 = vld [vmem:[#allocation8 + $0x128] sm:$0xff]  ;;  %v158_v63 = vld [vmem:[#allocation8] sm:$0xff] }
  0x2c   :  { %276 = vmatpush.msrb.mxu0 %v173_v38  ;;  %237 = vmatpush.msra.mxu2 %v170_v39  ;;  %v192_v0 = vld [vmem:[#allocation8 + $0x110] sm:$0xff]  ;;  %v159_v1 = vld [vmem:[#allocation8 + $0x8] sm:$0xff]  ;;  %v193_v2 = vld [vmem:[#allocation8 + $0x118] sm:$0xff] }
  0x2d   :  { %256 = vmatpush.msra.mxu3 %v204_v40  ;;  %296 = vmatpush.msrb.mxu1 %v205_v41  ;;  %v190_v3 = vld [vmem:[#allocation8 + $0x100] sm:$0xff]  ;;  %v191_v4 = vld [vmem:[#allocation8 + $0x108] sm:$0xff]  ;;  %v341_v5 = vld [vmem:[#allocation10 + $0xf8] sm:$0xff] }
  0x2e   :  { %277 = vmatpush.msrb.mxu0 %v171_v42  ;;  %238 = vmatpush.msra.mxu2 %v168_v43  ;;  %v340_v6 = vld [vmem:[#allocation10 + $0xf0] sm:$0xff]  ;;  %v325_v7 = vld [vmem:[#allocation10 + $0x78] sm:$0xff]  ;;  %v339_v9 = vld [vmem:[#allocation10 + $0xe8] sm:$0xff] }
  0x2f   :  { %257 = vmatpush.msra.mxu3 %v202_v44  ;;  %297 = vmatpush.msrb.mxu1 %v203_v45  ;;  %v324_v8 = vld [vmem:[#allocation10 + $0x70] sm:$0xff]  ;;  %v323_v10 = vld [vmem:[#allocation10 + $0x68] sm:$0xff]  ;;  %v338_v11 = vld [vmem:[#allocation10 + $0xe0] sm:$0xff] }
  0x30   :  { %278 = vmatpush.msrb.mxu0 %v169_v46  ;;  %239 = vmatpush.msra.mxu2 %v166_v47  ;;  %v322_v12 = vld [vmem:[#allocation10 + $0x60] sm:$0xff]  ;;  %v337_v13 = vld [vmem:[#allocation10 + $0xd8] sm:$0xff]  ;;  %v336_v15 = vld [vmem:[#allocation10 + $0xd0] sm:$0xff] }
  0x31   :  { %258 = vmatpush.msra.mxu3 %v200_v48  ;;  %298 = vmatpush.msrb.mxu1 %v201_v49  ;;  %v321_v14 = vld [vmem:[#allocation10 + $0x58] sm:$0xff]  ;;  %v320_v16 = vld [vmem:[#allocation10 + $0x50] sm:$0xff]  ;;  %v335_v17 = vld [vmem:[#allocation10 + $0xc8] sm:$0xff] }
  0x32   :  { %279 = vmatpush.msrb.mxu0 %v167_v50  ;;  %240 = vmatpush.msra.mxu2 %v164_v51  ;;  %v319_v18 = vld [vmem:[#allocation10 + $0x48] sm:$0xff]  ;;  %v334_v19 = vld [vmem:[#allocation10 + $0xc0] sm:$0xff]  ;;  %v333_v21 = vld [vmem:[#allocation10 + $0xb8] sm:$0xff] }
  0x33   :  { %259 = vmatpush.msra.mxu3 %v198_v52  ;;  %299 = vmatpush.msrb.mxu1 %v199_v53  ;;  %v318_v20 = vld [vmem:[#allocation10 + $0x40] sm:$0xff]  ;;  %v317_v22 = vld [vmem:[#allocation10 + $0x38] sm:$0xff]  ;;  %v332_v23 = vld [vmem:[#allocation10 + $0xb0] sm:$0xff] }
  0x34   :  { %280 = vmatpush.msrb.mxu0 %v165_v54  ;;  %241 = vmatpush.msra.mxu2 %v162_v55  ;;  %v331_v24 = vld [vmem:[#allocation10 + $0xa8] sm:$0xff]  ;;  %v106_v25 = vld [vmem:[#allocation7] sm:$0x3]  ;;  %v330_v26 = vld [vmem:[#allocation10 + $0xa0] sm:$0xff] }
  0x35   :  { %260 = vmatpush.msra.mxu3 %v196_v56  ;;  %300 = vmatpush.msrb.mxu1 %v197_v58  ;;  %v108_v27 = vperm.slane %v106_v25, 0  ;;  %v109_v28 = vperm.slane %v106_v25, 1  ;;  %v316_v35 = vld [vmem:[#allocation10 + $0x30] sm:$0xff]  ;;  %v329_v36 = vld [vmem:[#allocation10 + $0x98] sm:$0xff]  ;;  %v315_v37 = vld [vmem:[#allocation10 + $0x28] sm:$0xff] }
  0x36   :  { %281 = vmatpush.msrb.mxu0 %v163_v57  ;;  %242 = vmatpush.msra.mxu2 %v160_v59  ;;  %v328_v38 = vld [vmem:[#allocation10 + $0x90] sm:$0xff]  ;;  %v314_v39 = vld [vmem:[#allocation10 + $0x20] sm:$0xff]  ;;  %v327_v40 = vld [vmem:[#allocation10 + $0x88] sm:$0xff]  ;;  %v386_v59 = vlaneseq }
  0x37   :  { %261 = vmatpush.msra.mxu3 %v194_v60  ;;  %301 = vmatpush.msrb.mxu1 %v195_v62  ;;  %v313_v41 = vld [vmem:[#allocation10 + $0x18] sm:$0xff]  ;;  %v326_v42 = vld [vmem:[#allocation10 + $0x80] sm:$0xff]  ;;  %v312_v43 = vld [vmem:[#allocation10 + $0x10] sm:$0xff] }
  0x38   :  { %282 = vmatpush.msrb.mxu0 %v161_v61  ;;  %243 = vmatpush.msra.mxu2 %v158_v63  ;;  %v311_v44 = vld [vmem:[#allocation10 + $0x8] sm:$0xff]  ;;  %v310_v45 = vld [vmem:[#allocation10] sm:$0xff]  ;;  %v222_v46 = vld [vmem:[%s681_s4] sm:$0x3]  ;;  %v387_v61 = vand.u32 127, %v386_v59  ;;  %s612_s4 = smov [#allocation11]  }
  0x39   :  { %262 = vmatpush.msra.mxu3 %v192_v0  ;;  %302 = vmatpush.msrb.mxu1 %v193_v2  ;;  %v225_v47 = vperm.slane %v222_v46, 1  ;;  %v224_v52 = vperm.slane %v222_v46, 0  ;;  %v446_v60 = vld [vmem:[%s683_s6] ss:$0 sm:$0xff]  ;;  %s420_s6 = sshll.u32 %s612_s4, 4  ;;  %s421_s6 = int_to_ptr.vmem [resolvable:$true] %s420_s6 }
  0x3a   :  { %283 = vmatpush.msrb.mxu0 %v159_v1  ;;  %346 = vmatpush.msrb.mxu2 %v325_v7  ;;  %vm388_vm1 = vcmp.lt.s32.totalorder %v387_v61, 8  ;;  %vm412_vm6 = vcmp.eq.s32.totalorder %v387_v61, 8 }
  0x3b   :  { %263 = vmatpush.msra.mxu3 %v190_v3  ;;  %303 = vmatpush.msrb.mxu1 %v191_v4 }
  0x3c   :  { %347 = vmatpush.msrb.mxu2 %v324_v8 }
  0x3d   :  { %366 = vmatpush.msrb.mxu3 %v341_v5 }
  0x3e   :  { %348 = vmatpush.msrb.mxu2 %v323_v10 }
  0x3f   :  { %367 = vmatpush.msrb.mxu3 %v340_v6 }
  0x40   :  { %349 = vmatpush.msrb.mxu2 %v322_v12 }
  0x41   :  { %368 = vmatpush.msrb.mxu3 %v339_v9 }
  0x42   :  { %350 = vmatpush.msrb.mxu2 %v321_v14 }
  0x43   :  { %369 = vmatpush.msrb.mxu3 %v338_v11 }
  0x44   :  { %351 = vmatpush.msrb.mxu2 %v320_v16 }
  0x45   :  { %370 = vmatpush.msrb.mxu3 %v337_v13 }
  0x46   :  { %352 = vmatpush.msrb.mxu2 %v319_v18 }
  0x47   :  { %371 = vmatpush.msrb.mxu3 %v336_v15 }
  0x48   :  { %353 = vmatpush.msrb.mxu2 %v318_v20 }
  0x49   :  { %372 = vmatpush.msrb.mxu3 %v335_v17 }
  0x4a   :  { %354 = vmatpush.msrb.mxu2 %v317_v22 }
  0x4b   :  { %373 = vmatpush.msrb.mxu3 %v334_v19 }
  0x4c   :  { %355 = vmatpush.msrb.mxu2 %v316_v35 }
  0x4d   :  { %374 = vmatpush.msrb.mxu3 %v333_v21 }
  0x4e   :  { %356 = vmatpush.msrb.mxu2 %v315_v37 }
  0x4f   :  { %375 = vmatpush.msrb.mxu3 %v332_v23 }
  0x50   :  { %357 = vmatpush.msrb.mxu2 %v314_v39 }
  0x51   :  { %376 = vmatpush.msrb.mxu3 %v331_v24 }
  0x52   :  { %358 = vmatpush.msrb.mxu2 %v313_v41 }
  0x53   :  { %377 = vmatpush.msrb.mxu3 %v330_v26 }
  0x54   :  { %359 = vmatpush.msrb.mxu2 %v312_v43 }
  0x55   :  { %378 = vmatpush.msrb.mxu3 %v329_v36 }
  0x56   :  { %360 = vmatpush.msrb.mxu2 %v311_v44 }
  0x57   :  { %379 = vmatpush.msrb.mxu3 %v328_v38 }
  0x58   :  { %361 = vmatpush.msrb.mxu2 %v310_v45 }
  0x59   :  { %380 = vmatpush.msrb.mxu3 %v327_v40 }
  0x5b   :  { %381 = vmatpush.msrb.mxu3 %v326_v42 }
  0x98   :  { %v133_v29 = vpop.f32.mrf.mxu0  ;;  %v153_v30 = vpop.f32.mrf.mxu1 }
  0x99   :  { %v134_v31 = vadd.f32 %v133_v29, %v108_v27  ;;  %v154_v32 = vadd.f32 %v153_v30, %v109_v28 }
  0x9b   :  { %v156_v33 = vmax.f32 %v134_v31, 0.0  ;;  %v157_v34 = vmax.f32 %v154_v32, 0.0 }
  0x9d   :  { %244 = vmatmul.f32.vlgmr.msra.gmra.mxu2 %v156_v33  ;;  %284 = vmatmul.f32.vlgmr.msrb.gmra.mxu0 %v156_v33 }
  0x9e   :  { %264 = vmatmul.f32.vlgmr.msra.gmra.mxu3 %v157_v34  ;;  %304 = vmatmul.f32.vlgmr.msrb.gmra.mxu1 %v157_v34 }
 0x11a   :  { %v285_v48 = vpop.f32.mrf.mxu0 }
 0x11b   :  { %v286_v49 = vadd.f32 %v285_v48, %v225_v47  ;;  %v305_v50 = vpop.f32.mrf.mxu1 }
 0x11d   :  { %v306_v51 = vadd.f32 %v305_v50, %v286_v49 }
 0x11f   :  { %v309_v53 = vmax.f32 %v306_v51, 0.0 }
 0x120   :  { %v245_v54 = vpop.f32.mrf.mxu2 }
 0x121   :  { %v246_v55 = vadd.f32 %v245_v54, %v224_v52  ;;  %382 = vmatmul.f32.vlgmr.msrb.gmra.mxu3 %v309_v53  ;;  %v265_v56 = vpop.f32.mrf.mxu3 }
 0x123   :  { %v266_v57 = vadd.f32 %v265_v56, %v246_v55 }
 0x125   :  { %v308_v58 = vmax.f32 %v266_v57, 0.0 }
 0x127   :  { %362 = vmatmul.f32.vlgmr.msrb.gmra.mxu2 %v308_v58 }
 0x1a4   :  { %v383_v0 = vpop.f32.mrf.mxu3 }
 0x1aa   :  { %v363_v62 = vpop.f32.mrf.mxu2 }
 0x1ab   :  { %v364_v63 = vadd.f32 %v446_v60, %v363_v62 }
 0x1ad   :  { %v384_v1 = vadd.f32 %v383_v0, %v364_v63 }
 0x1af   :  { %v389_v2 = vsel %vm388_vm1, %v384_v1, -inf }
 0x1b0   :  { %390 = vmax.xlane.f32.xlu0 %v389_v2 }
 0x223   :  { %v391_v3 = vpop.xlane.xlu0 %390 }
 0x224   :  { %v392_v4 = vsub.f32 %v389_v2, %v391_v3 }
 0x226   :  { %v393_v5 = vmul.f32 1.442695, %v392_v4 }
 0x228   :  { %447 = vpow2.f32 %v393_v5 }
 0x22e   :  { %v448_v6 = vpop.eup %447 }
 0x22f   :  { %395 = vadd.xlane.f32.xlu0 %v448_v6 }
 0x2a2   :  { %v396_v7 = vpop.xlane.xlu0 %395 }
 0x2a3   :  { %449 = vrcp.f32 %v396_v7  ;;  %v408_v11 = vand.u32 2147483648, %v396_v7  ;;  %v406_v13 = vand.u32 2147483647, %v396_v7  ;;  %vm402_vm3 = vweird.f32 %v396_v7 }
 0x2a5   :  { %v409_v15 = vor.u32 1.1754944e-38, %v408_v11  ;;  %vm407_vm5 = vcmp.eq.f32.partialorder %v406_v13, 8.507059e+37 }
 0x2a9   :  { %v450_v8 = vpop.eup %449 }
 0x2aa   :  { %v398_v9 = vmul.f32 %v450_v8, %v396_v7  ;;  %vm403_vm2 = vweird.f32 %v450_v8 }
 0x2ab   :  { %vm404_vm4 = vmor %vm402_vm3, %vm403_vm2 }
 0x2ac   :  { %v399_v10 = vsub.f32 1.0, %v398_v9 }
 0x2ae   :  { %v400_v12 = vmul.f32 %v450_v8, %v399_v10 }
 0x2b0   :  { %v401_v14 = vadd.f32 %v450_v8, %v400_v12 }
 0x2b2   :  { %v405_v16 = vsel %vm404_vm4, %v450_v8, %v401_v14 }
 0x2b3   :  { %v410_v17 = vsel %vm407_vm5, %v409_v15, %v405_v16 }
 0x2b4   :  { %v411_v18 = vmul.f32 %v448_v6, %v410_v17 }
 0x2b6   :  { %v413_v19 = vsel %vm412_vm6, %v384_v1, %v411_v18 }
 0x2b7   :  { %414 = vst [vmem:[#allocation11] sm:$0xff] %v413_v19 }
 0x2b8   :  { %425 = dma.vmem_to_hbm [thread:$0]  %s421_s6, 128, %s423_s8, [#allocation4]  }
 0x2b9   :  { %601 = dma.done.wait [#allocation4], 128  }
 0x2ba   :  { %602 = vsyncadd [#allocation4], 4294967168 }
 0x2bb   :  { %430 = vsyncpa [#allocation3], 1 }
 0x2bc   :  { %431 = vsyncpa [#allocation6], 1 }
 0x2bd   :  { %432 = vsyncpa [#allocation9], 1 }
 0x2be   :  { %433 = vsyncpa [#allocation4], 1 }

</bundles_post_ra>
